<compile_context>
chip_gen: v7x
topology: tpu7x:2x2x1
jax: 0.10.0
libtpu: 0.0.40
codegen_flags: <defaults>
</compile_context>

<pallas_src>
import functools

import jax
import jax.numpy as jnp
from jax.experimental import pallas as pl
from jax.experimental.pallas import tpu as pltpu


def policy_net_kernel(x_ref, w1_ref, b1_ref, w2_ref, b2_ref, w3_ref, b3_ref, o_ref):
    # Layer 1: linear + relu (f32 accumulation on the MXU)
    h = jnp.dot(x_ref[...], w1_ref[...], preferred_element_type=jnp.float32)
    h = jnp.maximum(h + b1_ref[...], 0.0)
    # Layer 2: linear + relu
    h = jnp.dot(h.astype(w2_ref.dtype), w2_ref[...], preferred_element_type=jnp.float32)
    h = jnp.maximum(h + b2_ref[...], 0.0)
    # Layer 3: linear + tanh (output stays at the true actiondim width)
    h = jnp.dot(h.astype(w3_ref.dtype), w3_ref[...], preferred_element_type=jnp.float32)
    o_ref[...] = jnp.tanh(h + b3_ref[...]).astype(o_ref.dtype)


def _round_up(x, m):
    return ((x + m - 1) // m) * m


def _choose_tile(B, tile_b, min_steps):
    """Batch tile: multiple of 8, <= tile_b, aiming for >= min_steps grid steps
    (v7x has 2 TensorCores + keeps the DMA pipeline warm), and preferring a
    tile that divides B exactly so no wrapper-side jnp.pad copy is needed."""
    if B <= 8:
        return 8
    cap = max(8, (min(tile_b, B) // 8) * 8)          # largest mult-of-8 <= min(tile_b, B)
    target = min(cap, _round_up(pl.cdiv(B, min_steps), 8))
    target = max(target, 8)
    if B % 8 == 0:
        lo = max(8, target // 2)
        for tb in range(target, lo - 1, -8):         # bounded search, trace-time only
            if B % tb == 0:
                return tb
    return target


@functools.partial(jax.jit, static_argnames=("tile_b", "min_grid_steps", "use_bf16"))
def policy_net_forward(state, params, tile_b=4096, min_grid_steps=4, use_bf16=False):
    """state: [B, statedim] float32; params: dict of w1,b1,w2,b2,w3,b3."""
    w1, b1, w2, b2, w3, b3 = (
        params["w1"], params["b1"], params["w2"],
        params["b2"], params["w3"], params["b3"],
    )
    B, statedim = state.shape
    hiddendim = w1.shape[1]
    actiondim = w3.shape[1]

    # ---- Lane-dense hidden dim: pad hiddendim to a multiple of 128. --------
    # relu(0)=0 and zero rows/cols contribute nothing, so numerics are exact.
    H_pad = _round_up(hiddendim, 128)
    if H_pad != hiddendim:
        dh = H_pad - hiddendim
        w1 = jnp.pad(w1, ((0, 0), (0, dh)))
        b1 = jnp.pad(b1, ((0, 0), (0, dh)))
        w2 = jnp.pad(w2, ((0, dh), (0, dh)))
        b2 = jnp.pad(b2, ((0, 0), (0, dh)))
        w3 = jnp.pad(w3, ((0, dh), (0, 0)))

    # ---- Optional bf16 streaming (halves state/weight HBM bytes). ----------
    if use_bf16:
        state = state.astype(jnp.bfloat16)
        w1 = w1.astype(jnp.bfloat16)
        w2 = w2.astype(jnp.bfloat16)
        w3 = w3.astype(jnp.bfloat16)
        # biases stay f32: they are added to the f32 MXU accumulator.

    # ---- Batch tiling. ------------------------------------------------------
    tb = _choose_tile(B, tile_b, min_grid_steps)
    n_steps = pl.cdiv(B, tb)
    B_pad = n_steps * tb
    if B_pad != B:
        state = jnp.pad(state, ((0, B_pad - B), (0, 0)))

    # Batch-tiled state/output; weights & biases resident (constant block).
    def const_spec(arr):
        return pl.BlockSpec(arr.shape, lambda i: (0, 0))

    out = pl.pallas_call(
        policy_net_kernel,
        out_shape=jax.ShapeDtypeStruct((B_pad, actiondim), jnp.float32),
        grid=(n_steps,),
        in_specs=[
            pl.BlockSpec((tb, statedim), lambda i: (i, 0)),   # state tile
            const_spec(w1), const_spec(b1),
            const_spec(w2), const_spec(b2),
            const_spec(w3), const_spec(b3),
        ],
        out_specs=pl.BlockSpec((tb, actiondim), lambda i: (i, 0)),
        compiler_params=pltpu.CompilerParams(
            dimension_semantics=("parallel",),
        ),
    )(state, w1, b1, w2, b2, w3, b3)

    if B_pad != B:
        out = out[:B]
    return out


def init_policy_net_params(key, statedim, hiddendim, actiondim, init_w=0.0003):
    """Deterministic synthetic init mirroring the PyTorch module's shapes.

    linear1/linear2: PyTorch default uniform(-1/sqrt(fan_in), 1/sqrt(fan_in))
    linear3: uniform(-init_w, init_w) for both weight and bias.
    Weights stored as [in, out].
    """
    k1, k2, k3, k4, k5, k6 = jax.random.split(key, 6)
    bound1 = 1.0 / jnp.sqrt(statedim)
    bound2 = 1.0 / jnp.sqrt(hiddendim)
    params = {
        "w1": jax.random.uniform(k1, (statedim, hiddendim), jnp.float32, -bound1, bound1),
        "b1": jax.random.uniform(k2, (1, hiddendim), jnp.float32, -bound1, bound1),
        "w2": jax.random.uniform(k3, (hiddendim, hiddendim), jnp.float32, -bound2, bound2),
        "b2": jax.random.uniform(k4, (1, hiddendim), jnp.float32, -bound2, bound2),
        "w3": jax.random.uniform(k5, (hiddendim, actiondim), jnp.float32, -init_w, init_w),
        "b3": jax.random.uniform(k6, (1, actiondim), jnp.float32, -init_w, init_w),
    }
    return params


def policy_net_reference(state, params):
    """Pure-JAX reference for correctness checking."""
    h1 = jnp.maximum(state @ params["w1"] + params["b1"], 0.0)
    h2 = jnp.maximum(h1 @ params["w2"] + params["b2"], 0.0)
    return jnp.tanh(h2 @ params["w3"] + params["b3"])


if __name__ == "__main__":
    # Small shapes consistent with the module's forward: batch=8, statedim=16,
    # hiddendim=32, actiondim=8.
    B, statedim, hiddendim, actiondim = 8, 16, 32, 8

    key = jax.random.PRNGKey(0)
    pkey, xkey, xkey2 = jax.random.split(key, 3)
    params = init_policy_net_params(pkey, statedim, hiddendim, actiondim)
    state = jax.random.normal(xkey, (B, statedim), dtype=jnp.float32)

    # f32 path: exact (1e-5) against the pure-JAX reference.
    out = jax.block_until_ready(policy_net_forward(state, params))
    ref = policy_net_reference(state, params)
    assert out.shape == (B, actiondim)
    assert jnp.allclose(out, ref, atol=1e-5, rtol=1e-5)

    # Multi-tile (grid > 1) path: B not a multiple of the tile.
    B2 = 1030
    state2 = jax.random.normal(xkey2, (B2, statedim), dtype=jnp.float32)
    out2 = jax.block_until_ready(policy_net_forward(state2, params))
    ref2 = policy_net_reference(state2, params)
    assert out2.shape == (B2, actiondim)
    assert jnp.allclose(out2, ref2, atol=1e-5, rtol=1e-5)

    # bf16-streaming path: relaxed tolerance (bf16 inputs, f32 accumulation).
    out3 = jax.block_until_ready(policy_net_forward(state2, params, use_bf16=True))
    assert out3.shape == (B2, actiondim)
    assert jnp.allclose(out3, ref2, atol=2e-2, rtol=5e-2)

    # TODO(synk): select_action / eval_action / gumbel_softmax sampling paths
    # (Gumbel & Normal noise) are inference-time stochastic helpers, not part
    # of forward(); not implemented in the kernel.

    print("KERNEL_OK")
</pallas_src>

<mosaic_0001>
module attributes {stable_mosaic.version = 11 : i64} {
  func.func @policy_net_kernel(%arg0: i32, %arg1: memref<8x16xf32, #tpu.memory_space<vmem>>, %arg2: memref<16x128xf32, #tpu.memory_space<vmem>>, %arg3: memref<1x128xf32, #tpu.memory_space<vmem>>, %arg4: memref<128x128xf32, #tpu.memory_space<vmem>>, %arg5: memref<1x128xf32, #tpu.memory_space<vmem>>, %arg6: memref<128x8xf32, #tpu.memory_space<vmem>>, %arg7: memref<1x8xf32, #tpu.memory_space<vmem>>, %arg8: memref<8x8xf32, #tpu.memory_space<vmem>>) attributes {dimension_semantics = [#tpu.dimension_semantics<parallel>], iteration_bounds = array<i64: 1>, scalar_prefetch = 0 : i64, scratch_operands = 0 : i64, tpu.core_type = #tpu.core_type<tc>, window_params = [{transform_indices = @transform_0, window_bounds = array<i64: 8, 16>}, {pipeline_mode = #tpu.pipeline_mode<synchronous>, transform_indices = @transform_1, window_bounds = array<i64: 16, 128>}, {pipeline_mode = #tpu.pipeline_mode<synchronous>, transform_indices = @transform_2, window_bounds = array<i64: 1, 128>}, {pipeline_mode = #tpu.pipeline_mode<synchronous>, transform_indices = @transform_3, window_bounds = array<i64: 128, 128>}, {pipeline_mode = #tpu.pipeline_mode<synchronous>, transform_indices = @transform_4, window_bounds = array<i64: 1, 128>}, {pipeline_mode = #tpu.pipeline_mode<synchronous>, transform_indices = @transform_5, window_bounds = array<i64: 128, 8>}, {pipeline_mode = #tpu.pipeline_mode<synchronous>, transform_indices = @transform_6, window_bounds = array<i64: 1, 8>}, {transform_indices = @transform_7, window_bounds = array<i64: 8, 8>}]} {
    %c0 = arith.constant 0 : index
    %c0_0 = arith.constant 0 : index
    %0 = vector.load %arg1[%c0, %c0_0] : memref<8x16xf32, #tpu.memory_space<vmem>>, vector<8x16xf32>
    %c0_1 = arith.constant 0 : index
    %c0_2 = arith.constant 0 : index
    %1 = vector.load %arg2[%c0_1, %c0_2] : memref<16x128xf32, #tpu.memory_space<vmem>>, vector<16x128xf32>
    %cst = arith.constant dense<0.000000e+00> : vector<8x128xf32>
    %2 = tpu.matmul %0, %1, %cst {dimension_numbers = #tpu.dot_dimension_numbers<[1], [0], [0], [1], [0, 0, 1, 1], [], []>} : vector<8x16xf32>, vector<16x128xf32>, vector<8x128xf32> -> vector<8x128xf32>
    %c0_3 = arith.constant 0 : index
    %c0_4 = arith.constant 0 : index
    %3 = vector.load %arg3[%c0_3, %c0_4] : memref<1x128xf32, #tpu.memory_space<vmem>>, vector<1x128xf32>
    %4 = vector.broadcast %3 : vector<1x128xf32> to vector<8x128xf32>
    %5 = arith.addf %2, %4 : vector<8x128xf32>
    %cst_5 = arith.constant 0.000000e+00 : f32
    %6 = vector.broadcast %cst_5 : f32 to vector<8x128xf32>
    %7 = arith.maximumf %5, %6 : vector<8x128xf32>
    %c0_6 = arith.constant 0 : index
    %c0_7 = arith.constant 0 : index
    %8 = vector.load %arg4[%c0_6, %c0_7] : memref<128x128xf32, #tpu.memory_space<vmem>>, vector<128x128xf32>
    %cst_8 = arith.constant dense<0.000000e+00> : vector<8x128xf32>
    %9 = tpu.matmul %7, %8, %cst_8 {dimension_numbers = #tpu.dot_dimension_numbers<[1], [0], [0], [1], [0, 0, 1, 1], [], []>} : vector<8x128xf32>, vector<128x128xf32>, vector<8x128xf32> -> vector<8x128xf32>
    %c0_9 = arith.constant 0 : index
    %c0_10 = arith.constant 0 : index
    %10 = vector.load %arg5[%c0_9, %c0_10] : memref<1x128xf32, #tpu.memory_space<vmem>>, vector<1x128xf32>
    %11 = vector.broadcast %10 : vector<1x128xf32> to vector<8x128xf32>
    %12 = arith.addf %9, %11 : vector<8x128xf32>
    %cst_11 = arith.constant 0.000000e+00 : f32
    %13 = vector.broadcast %cst_11 : f32 to vector<8x128xf32>
    %14 = arith.maximumf %12, %13 : vector<8x128xf32>
    %c0_12 = arith.constant 0 : index
    %c0_13 = arith.constant 0 : index
    %15 = vector.load %arg6[%c0_12, %c0_13] : memref<128x8xf32, #tpu.memory_space<vmem>>, vector<128x8xf32>
    %cst_14 = arith.constant dense<0.000000e+00> : vector<8x8xf32>
    %16 = tpu.matmul %14, %15, %cst_14 {dimension_numbers = #tpu.dot_dimension_numbers<[1], [0], [0], [1], [0, 0, 1, 1], [], []>} : vector<8x128xf32>, vector<128x8xf32>, vector<8x8xf32> -> vector<8x8xf32>
    %c0_15 = arith.constant 0 : index
    %c0_16 = arith.constant 0 : index
    %17 = vector.load %arg7[%c0_15, %c0_16] : memref<1x8xf32, #tpu.memory_space<vmem>>, vector<1x8xf32>
    %18 = vector.broadcast %17 : vector<1x8xf32> to vector<8x8xf32>
    %19 = arith.addf %16, %18 : vector<8x8xf32>
    %20 = math.tanh %19 : vector<8x8xf32>
    %c0_17 = arith.constant 0 : index
    %c0_18 = arith.constant 0 : index
    %21 = vector.load %arg8[%c0_17, %c0_18] : memref<8x8xf32, #tpu.memory_space<vmem>>, vector<8x8xf32>
    tpu.vector_store %arg8[%c0_17, %c0_18], %20 {strides = array<i32>} : memref<8x8xf32, #tpu.memory_space<vmem>>, vector<8x8xf32>,
    return
  }
  func.func @transform_0(%arg0: i32) -> (i32, i32) {
    %c0_i32 = arith.constant 0 : i32
    %c0_i32_0 = arith.constant 0 : i32
    return %arg0, %c0_i32 : i32, i32
  }
  func.func @transform_1(%arg0: i32) -> (i32, i32) {
    %c0_i32 = arith.constant 0 : i32
    %c0_i32_0 = arith.constant 0 : i32
    %c0_i32_1 = arith.constant 0 : i32
    return %c0_i32, %c0_i32_0 : i32, i32
  }
  func.func @transform_2(%arg0: i32) -> (i32, i32) {
    %c0_i32 = arith.constant 0 : i32
    %c0_i32_0 = arith.constant 0 : i32
    %c0_i32_1 = arith.constant 0 : i32
    return %c0_i32, %c0_i32_0 : i32, i32
  }
  func.func @transform_3(%arg0: i32) -> (i32, i32) {
    %c0_i32 = arith.constant 0 : i32
    %c0_i32_0 = arith.constant 0 : i32
    %c0_i32_1 = arith.constant 0 : i32
    return %c0_i32, %c0_i32_0 : i32, i32
  }
  func.func @transform_4(%arg0: i32) -> (i32, i32) {
    %c0_i32 = arith.constant 0 : i32
    %c0_i32_0 = arith.constant 0 : i32
    %c0_i32_1 = arith.constant 0 : i32
    return %c0_i32, %c0_i32_0 : i32, i32
  }
  func.func @transform_5(%arg0: i32) -> (i32, i32) {
    %c0_i32 = arith.constant 0 : i32
    %c0_i32_0 = arith.constant 0 : i32
    %c0_i32_1 = arith.constant 0 : i32
    return %c0_i32, %c0_i32_0 : i32, i32
  }
  func.func @transform_6(%arg0: i32) -> (i32, i32) {
    %c0_i32 = arith.constant 0 : i32
    %c0_i32_0 = arith.constant 0 : i32
    %c0_i32_1 = arith.constant 0 : i32
    return %c0_i32, %c0_i32_0 : i32, i32
  }
  func.func @transform_7(%arg0: i32) -> (i32, i32) {
    %c0_i32 = arith.constant 0 : i32
    %c0_i32_0 = arith.constant 0 : i32
    return %arg0, %c0_i32 : i32, i32
  }
}

</mosaic_0001>

<bundles_post_ra>
// kernel: policy_net_forward.1
= control target key start
LH: loop header
LB: loop body
LE: loop exit
PB: predicated region body
PF: predicated region fallthrough
CT: control target
= control target key end

     0   :  { %v515_v2 = vmov 0.0|0.0   ;;  %vm516_vm0 = vmmov 0   ;;  %v517_v4 = vmov 0.0   ;;  %vm37_vm1 = vcmask 130048   ;;  %s705_s0 = inlined_call_operand.vmem [shape: f32[8,16], index: 0, kind: input, shape index: {}]   ;;  %s706_s1 = inlined_call_operand.vmem [shape: f32[16,128], index: 1, kind: input, shape index: {}]   ;;  %s707_s2 = inlined_call_operand.vmem [shape: f32[1,128], index: 2, kind: input, shape index: {}]   ;;  %s708_s3 = inlined_call_operand.vmem [shape: f32[128,128], index: 3, kind: input, shape index: {}]   ;;  %s709_s4 = inlined_call_operand.vmem [shape: f32[1,128], index: 4, kind: input, shape index: {}]   ;;  %s710_s5 = inlined_call_operand.vmem [shape: f32[128,8], index: 5, kind: input, shape index: {}]   ;;  %s711_s6 = inlined_call_operand.vmem [shape: f32[1,8], index: 6, kind: input, shape index: {}]   ;;  %s712_s7 = inlined_call_operand.hbm [shape: f32[8,8], index: 7, kind: output, shape index: {}]  }
   0x1   :  { %v28_v0 = vld [vmem:[%s706_s1] sm:$0xff]  ;;  %v29_v1 = vld [vmem:[%s706_s1 + $0x8] sm:$0xff]  ;;  %434 = vmatprep.subr.bf16.mxu0 %v515_v2  ;;  %361 = vmatprep.mubr.msk.f32.mxu0 %vm516_vm0, %v517_v4  ;;  %v114_v7 = vld [vmem:[%s708_s3 + $0x10] sm:$0xff] }
   0x2   :  { %v435_v3 = vpack.c.bf16 %v29_v1, %v28_v0  ;;  %v112_v5 = vld [vmem:[%s708_s3] sm:$0xff]  ;;  %v113_v6 = vld [vmem:[%s708_s3 + $0x8] sm:$0xff]  ;;  %437 = vmatprep.subr.bf16.mxu1 %v515_v2  ;;  %v115_v9 = vld [vmem:[%s708_s3 + $0x18] sm:$0xff]  ;;  %396 = vmatprep.mubr.msk.f32.mxu1 %vm516_vm0, %v517_v4 }
   0x3   :  { %v438_v8 = vpack.c.bf16 %v113_v6, %v112_v5  ;;  %v27_v10 = vld [vmem:[%s705_s0] sm:$0xff]  ;;  %v441_v11 = vpack.c.bf16 %v115_v9, %v114_v7  ;;  %v117_v13 = vld [vmem:[%s708_s3 + $0x28] sm:$0xff] }
   0x4   :  { %436 = vmatpush3.bf16.msra.mxu0 %v435_v3  ;;  %v116_v12 = vld [vmem:[%s708_s3 + $0x20] sm:$0xff] }
   0x5   :  { %439 = vmatpush3.bf16.msra.mxu1 %v438_v8  ;;  %461 = vmatprep.subr.bf16.mxu0 %v515_v2 }
   0x6   :  { %440 = vmatprep.subr.bf16.mxu1 %v515_v2 }
   0x7   :  { %362 = vmatmul.mubr.msk.f32.vlgmr.msra.gmra.mrb[0].mxu0 %vm37_vm1, %v27_v10 }
   0x8   :  { %12 = vsyncpa [#allocation3], 0  ;;  %431 = vmatprep.mubr.msk.f32.mxu0 %vm516_vm0, %v517_v4  ;;  %v444_v14 = vpack.c.bf16 %v117_v13, %v116_v12  ;;  %v118_v15 = vld [vmem:[%s708_s3 + $0x30] sm:$0xff]  ;;  %v119_v16 = vld [vmem:[%s708_s3 + $0x38] sm:$0xff]  ;;  %vm300_vm2 = vcmask 64512  }
   0x9   :  { %442 = vmatpush3.bf16.msra.mxu1 %v441_v11  ;;  %v447_v17 = vpack.c.bf16 %v119_v16, %v118_v15  ;;  %v120_v18 = vld [vmem:[%s708_s3 + $0x40] sm:$0xff]  ;;  %v121_v19 = vld [vmem:[%s708_s3 + $0x48] sm:$0xff]  ;;  %v122_v21 = vld [vmem:[%s708_s3 + $0x50] sm:$0xff] }
   0xa   :  { %443 = vmatprep.subr.bf16.mxu1 %v515_v2  ;;  %v450_v20 = vpack.c.bf16 %v121_v19, %v120_v18  ;;  %v123_v22 = vld [vmem:[%s708_s3 + $0x58] sm:$0xff]  ;;  %v124_v24 = vld [vmem:[%s708_s3 + $0x60] sm:$0xff]  ;;  %v125_v25 = vld [vmem:[%s708_s3 + $0x68] sm:$0xff] }
   0xb   :  { %v453_v23 = vpack.c.bf16 %v123_v22, %v122_v21  ;;  %v456_v26 = vpack.c.bf16 %v125_v25, %v124_v24  ;;  %v126_v27 = vld [vmem:[%s708_s3 + $0x70] sm:$0xff]  ;;  %v127_v28 = vld [vmem:[%s708_s3 + $0x78] sm:$0xff]  ;;  %v206_v30 = vld [vmem:[%s710_s5] sm:$0xff] }
   0xc   :  { %v459_v29 = vpack.c.bf16 %v127_v28, %v126_v27  ;;  %v207_v31 = vld [vmem:[%s710_s5 + $0x8] sm:$0xff]  ;;  %v208_v32 = vld [vmem:[%s710_s5 + $0x10] sm:$0xff]  ;;  %v209_v34 = vld [vmem:[%s710_s5 + $0x18] sm:$0xff] }
   0xd   :  { %445 = vmatpush3.bf16.msra.mxu1 %v444_v14  ;;  %v462_v33 = vpack.c.bf16 %v207_v31, %v206_v30  ;;  %v465_v35 = vpack.c.bf16 %v209_v34, %v208_v32  ;;  %v210_v36 = vld [vmem:[%s710_s5 + $0x20] sm:$0xff]  ;;  %v211_v37 = vld [vmem:[%s710_s5 + $0x28] sm:$0xff]  ;;  %v212_v39 = vld [vmem:[%s710_s5 + $0x30] sm:$0xff] }
   0xe   :  { %446 = vmatprep.subr.bf16.mxu1 %v515_v2  ;;  %v468_v38 = vpack.c.bf16 %v211_v37, %v210_v36  ;;  %v213_v40 = vld [vmem:[%s710_s5 + $0x38] sm:$0xff]  ;;  %v214_v42 = vld [vmem:[%s710_s5 + $0x40] sm:$0xff]  ;;  %v215_v43 = vld [vmem:[%s710_s5 + $0x48] sm:$0xff] }
   0xf   :  { %463 = vmatpush3.bf16.msra.mxu0 %v462_v33  ;;  %v471_v41 = vpack.c.bf16 %v213_v40, %v212_v39  ;;  %v474_v44 = vpack.c.bf16 %v215_v43, %v214_v42  ;;  %v216_v45 = vld [vmem:[%s710_s5 + $0x50] sm:$0xff]  ;;  %v217_v46 = vld [vmem:[%s710_s5 + $0x58] sm:$0xff]  ;;  %v218_v48 = vld [vmem:[%s710_s5 + $0x60] sm:$0xff] }
  0x10   :  { %464 = vmatprep.subr.bf16.mxu0 %v515_v2  ;;  %v477_v47 = vpack.c.bf16 %v217_v46, %v216_v45  ;;  %v219_v49 = vld [vmem:[%s710_s5 + $0x68] sm:$0xff]  ;;  %v316_v51 = vld [vmem:[%s707_s2] ss:$0 sm:$0xff]  ;;  %v220_v56 = vld [vmem:[%s710_s5 + $0x70] sm:$0xff] }
  0x11   :  { %448 = vmatpush3.bf16.msra.mxu1 %v447_v17  ;;  %v480_v50 = vpack.c.bf16 %v219_v49, %v218_v48  ;;  %v221_v57 = vld [vmem:[%s710_s5 + $0x78] sm:$0xff]  ;;  %v318_v59 = vld [vmem:[%s709_s4] ss:$0 sm:$0xff]  ;;  %s518_s5 = smov [#allocation2]  }
  0x12   :  { %449 = vmatprep.subr.bf16.mxu1 %v515_v2  ;;  %v483_v58 = vpack.c.bf16 %v221_v57, %v220_v56  ;;  %v319_v0 = vld [vmem:[%s711_s6] ss:$0 sm:$0xff]  ;;  %s308_s22 = sshll.u32 %s518_s5, 4  ;;  %s309_s22 = int_to_ptr.vmem [resolvable:$true] %s308_s22 }
  0x13   :  { %466 = vmatpush3.bf16.msra.mxu0 %v465_v35  ;;  %s491_s4 = scalar_lea.vmem %s309_s22, 128  ;;  %p496_p1 = scmp.lt.s32.totalorder %s309_s22, %s309_s22 }
  0x14   :  { %467 = vmatprep.subr.bf16.mxu0 %v515_v2  ;;  %p492_p0 = scmp.ne.s32.totalorder %s309_s22, %s491_s4  ;;  %p497_p2 = scmp.lt.s32.totalorder %s491_s4, %s491_s4 }
  0x15   :  { %451 = vmatpush3.bf16.msra.mxu1 %v450_v20 }
  0x16   :  { %452 = vmatprep.subr.bf16.mxu1 %v515_v2  ;;  %p498_p3 = por %p497_p2, %p496_p1 }
  0x17   :  { %469 = vmatpush3.bf16.msra.mxu0 %v468_v38 }
  0x18   :  { %470 = vmatprep.subr.bf16.mxu0 %v515_v2  ;;  %p499_p4 = pnand %p498_p3, %p492_p0 }
  0x19   :  { %454 = vmatpush3.bf16.msra.mxu1 %v453_v23 }
  0x1a   :  { %455 = vmatprep.subr.bf16.mxu1 %v515_v2 }
  0x1b   :  { %472 = vmatpush3.bf16.msra.mxu0 %v471_v41 }
  0x1c   :  { %473 = vmatprep.subr.bf16.mxu0 %v515_v2 }
  0x1d   :  { %457 = vmatpush3.bf16.msra.mxu1 %v456_v26 }
  0x1e   :  { %458 = vmatprep.subr.bf16.mxu1 %v515_v2 }
  0x1f   :  { %475 = vmatpush3.bf16.msra.mxu0 %v474_v44 }
  0x20   :  { %476 = vmatprep.subr.bf16.mxu0 %v515_v2 }
  0x21   :  { %460 = vmatpush3.bf16.msra.mxu1 %v459_v29 }
  0x23   :  { %478 = vmatpush3.bf16.msra.mxu0 %v477_v47 }
  0x24   :  { %479 = vmatprep.subr.bf16.mxu0 %v515_v2 }
  0x27   :  { %481 = vmatpush3.bf16.msra.mxu0 %v480_v50 }
  0x28   :  { %482 = vmatprep.subr.bf16.mxu0 %v515_v2 }
  0x2b   :  { %484 = vmatpush3.bf16.msra.mxu0 %v483_v58 }
  0xda   :  { %v107_v52 = vpop.f32.mrb[0].mxu0 }
  0xdb   :  { %v108_v53 = vadd.f32 %v316_v51, %v107_v52  ;;  %v363_v54 = vpop.f32.mrb[1].mxu0 }
  0xdd   :  { %v111_v55 = vmax.f32 %v108_v53, 0.0 }
  0xdf   :  { %397 = vmatmul.mubr.f32.vlgmr.msra.gmra.mrb[0].mxu1 %v111_v55 }
 0x1b2   :  { %v201_v60 = vpop.f32.mrb[0].mxu1 }
 0x1b3   :  { %v202_v61 = vadd.f32 %v318_v59, %v201_v60  ;;  %v398_v62 = vpop.f32.mrb[1].mxu1 }
 0x1b5   :  { %v205_v63 = vmax.f32 %v202_v61, 0.0 }
 0x1b7   :  { %432 = vmatmul.mubr.f32.vlgmr.msra.gmra.mrb[2].mxu0 %v205_v63 }
 0x28a   :  { %v295_v1 = vpop.f32.mrb[2].mxu0 }
 0x28b   :  { %v296_v2 = vadd.f32 %v319_v0, %v295_v1  ;;  %v433_v3 = vpop.f32.mrb[3].mxu0 }
 0x28d   :  { %489 = vtanh.f32 %v296_v2 }
 0x297   :  { %v490_v4 = vpop.eup %489 }
 0x298   :  { %301 = vst.msk [vmem:[#allocation2] sm:$0xff] %vm300_vm2, %v490_v4 }
 0x299   :  { %502 = shalt.err (!%p499_p4)
}
 0x29a   :  { %s503_s6 = scalar_lea.hbm %s712_s7, 128 }
 0x29b   :  { %p504_p5 = scmp.ne.s32.totalorder %s712_s7, %s503_s6  ;;  %p507_p6 = scmp.lt.u32.totalorder %s503_s6, %s712_s7 }
 0x29d   :  { %p509_p7 = pnand %p507_p6, %p504_p5 }
 0x29f   :  { %512 = shalt.err (!%p509_p7)
}
 0x2a0   :  { %311 = dma.vmem_to_hbm [thread:$0]  %s309_s22, 128, %s712_s7, [#allocation3]  }
 0x2a1   :  { %513 = dma.done.wait [#allocation3], 128  }
 0x2a2   :  { %514 = vsyncadd [#allocation3], 4294967168 }
 0x2a3   :  { %315 = vsyncpa [#allocation3], 1 }

</bundles_post_ra>
